<compile_context>
chip_gen: v7x
topology: tpu7x:2x2x1
jax: 0.10.0
libtpu: 0.0.40
codegen_flags: <defaults>
</compile_context>

<pallas_src>
import functools

import jax
import jax.numpy as jnp
from jax.experimental import pallas as pl
from jax.experimental.pallas import tpu as pltpu


_VMEM_DATA_BUDGET = 32 * 1024 * 1024   # budget for the double-buffered logits tile
_VMEM_LIMIT_BYTES = 48 * 1024 * 1024   # < v7x 64 MiB physical VMEM
_MAX_TILE_ROWS = 1024
_ROW_ALIGN = 16                        # bf16 sublane packing (also covers f32's 8)


def _ce_kernel(x_ref, t_ref, psum_ref, pcnt_ref, *, total_rows, tile_rows):
    i = pl.program_id(0)

    x = x_ref[...].astype(jnp.float32)          # (TM, C) upcast per tile
    t = t_ref[...]                              # (TM, 1) int32

    # Global row index -> mask for the ragged last tile (logits are NOT padded
    # in HBM; out-of-bounds rows may contain garbage and are masked out here).
    row = i * tile_rows + jax.lax.broadcasted_iota(jnp.int32, (tile_rows, 1), 0)
    in_bounds = row < total_rows                                        # (TM, 1)

    # Numerically stable log-sum-exp over the class (lane) axis.
    m = jnp.max(x, axis=-1, keepdims=True)                              # (TM, 1)
    lse = m + jnp.log(jnp.sum(jnp.exp(x - m), axis=-1, keepdims=True))  # (TM, 1)

    # Gather the target-class logit via an iota compare (VPU friendly).
    cls = jax.lax.broadcasted_iota(jnp.int32, x.shape, 1)               # (TM, C)
    tgt_logit = jnp.sum(jnp.where(cls == t, x, 0.0), axis=-1, keepdims=True)

    valid = in_bounds & (t != 0)                # ignore_index = 0
    row_loss = jnp.where(valid, lse - tgt_logit, 0.0)

    # Per-tile partials written to lane-dense (1, 8, 128) output blocks; the
    # global reduce + divide happens in the wrapper (keeps the grid axis
    # carry-free so it can be sharded across TensorCores).
    loss_sum = jnp.sum(row_loss).reshape(1, 1, 1)
    cnt_sum = jnp.sum(valid.astype(jnp.float32)).reshape(1, 1, 1)
    psum_ref[...] = jnp.broadcast_to(loss_sum, psum_ref.shape)
    pcnt_ref[...] = jnp.broadcast_to(cnt_sum, pcnt_ref.shape)


def _pick_tile_rows(num_rows, num_classes, itemsize):
    """Largest row tile (multiple of 16, <=1024) fitting the VMEM budget."""
    # TODO(synk): for very large vocab (where even 16 rows x C blows the VMEM
    # budget) add a second class-chunk grid axis with an online (flash-style)
    # LSE + running target-logit accumulator.
    bytes_per_row = max(num_classes * itemsize, 1)
    rows = _VMEM_DATA_BUDGET // (2 * bytes_per_row)          # 2x: double buffer
    rows = min(rows, _MAX_TILE_ROWS)
    rows_cap = -(-num_rows // _ROW_ALIGN) * _ROW_ALIGN       # cover R in 1 tile
    rows = min(rows, rows_cap)
    rows = max((rows // _ROW_ALIGN) * _ROW_ALIGN, _ROW_ALIGN)
    return int(rows)


@functools.partial(jax.jit, static_argnames=("tile_rows",))
def custom_cross_entropy_loss(logits, target, *, tile_rows=None):
    """logits: (N, T, C); target: (N, T) int -> mean CE with ignore_index=0."""
    N, T, C = logits.shape
    R = N * T

    # Views only: no dtype cast and no padding of the logits in HBM.
    x = logits.reshape(R, C)
    t = target.reshape(R, 1).astype(jnp.int32)   # tiny array

    if tile_rows is None:
        tile_rows = _pick_tile_rows(R, C, x.dtype.itemsize)
    num_tiles = -(-R // tile_rows)

    kernel = functools.partial(_ce_kernel, total_rows=R, tile_rows=tile_rows)

    psum, pcnt = pl.pallas_call(
        kernel,
        out_shape=(
            jax.ShapeDtypeStruct((num_tiles, 8, 128), jnp.float32),
            jax.ShapeDtypeStruct((num_tiles, 8, 128), jnp.float32),
        ),
        grid_spec=pltpu.PrefetchScalarGridSpec(
            num_scalar_prefetch=0,
            grid=(num_tiles,),
            in_specs=[
                pl.BlockSpec((tile_rows, C), lambda i: (i, 0)),
                pl.BlockSpec((tile_rows, 1), lambda i: (i, 0)),
            ],
            out_specs=[
                pl.BlockSpec((1, 8, 128), lambda i: (i, 0, 0)),
                pl.BlockSpec((1, 8, 128), lambda i: (i, 0, 0)),
            ],
        ),
        compiler_params=pltpu.CompilerParams(
            dimension_semantics=("parallel",),
            vmem_limit_bytes=_VMEM_LIMIT_BYTES,
        ),
    )(x, t)

    total_sum = jnp.sum(psum[:, 0, 0])
    # int32 count keeps the denominator exact beyond 2^24 valid tokens.
    total_cnt = jnp.sum(pcnt[:, 0, 0].astype(jnp.int32))
    # NOTE: if every target equals ignore_index (0) this divides by zero and
    # returns NaN, matching PyTorch's behaviour.
    return total_sum / total_cnt.astype(jnp.float32)


def _reference_loss(logits, target):
    # pure-JAX reference of nn.CrossEntropyLoss(reduction='mean', ignore_index=0)
    N, T, C = logits.shape
    x = logits.reshape(-1, C).astype(jnp.float32)
    t = target.reshape(-1).astype(jnp.int32)
    logp = jax.nn.log_softmax(x, axis=-1)
    nll = -jnp.take_along_axis(logp, t[:, None], axis=-1)[:, 0]
    valid = (t != 0).astype(jnp.float32)
    return jnp.sum(nll * valid) / jnp.sum(valid)


if __name__ == "__main__":
    key = jax.random.PRNGKey(0)
    k1, k2, k3, k4 = jax.random.split(key, 4)

    # Small shapes consistent with the module: batch=2, seq=8, classes=32 (f32).
    N, T, C = 2, 8, 32
    logits = jax.random.normal(k1, (N, T, C), dtype=jnp.float32)
    target = jax.random.randint(k2, (N, T), minval=0, maxval=C, dtype=jnp.int32)
    loss = jax.block_until_ready(custom_cross_entropy_loss(logits, target))
    ref = _reference_loss(logits, target)
    assert jnp.allclose(loss, ref, rtol=1e-5, atol=1e-5), (loss, ref)

    # Exercise the bf16 streaming path + multi-tile grid + ragged last tile.
    N2, T2, C2 = 4, 37, 128   # R = 148 rows -> 5 tiles of 32, last tile partial
    logits2 = jax.random.normal(k3, (N2, T2, C2), dtype=jnp.bfloat16)
    target2 = jax.random.randint(k4, (N2, T2), minval=0, maxval=C2, dtype=jnp.int32)
    loss2 = jax.block_until_ready(
        custom_cross_entropy_loss(logits2, target2, tile_rows=32))
    ref2 = _reference_loss(logits2, target2)
    assert jnp.allclose(loss2, ref2, rtol=1e-4, atol=1e-4), (loss2, ref2)

    print("KERNEL_OK")
</pallas_src>

<mosaic_0001>
module attributes {stable_mosaic.version = 11 : i64} {
  func.func @_ce_kernel(%arg0: i32, %arg1: memref<16x32xf32, #tpu.memory_space<vmem>>, %arg2: memref<16x1xi32, #tpu.memory_space<vmem>>, %arg3: memref<1x8x128xf32, #tpu.memory_space<vmem>>, %arg4: memref<1x8x128xf32, #tpu.memory_space<vmem>>) attributes {dimension_semantics = [#tpu.dimension_semantics<parallel>], iteration_bounds = array<i64: 1>, scalar_prefetch = 0 : i64, scratch_operands = 0 : i64, tpu.core_type = #tpu.core_type<tc>, window_params = [{transform_indices = @transform_0, window_bounds = array<i64: 16, 32>}, {transform_indices = @transform_1, window_bounds = array<i64: 16, 1>}, {transform_indices = @transform_2, window_bounds = array<i64: 1, 8, 128>}, {transform_indices = @transform_3, window_bounds = array<i64: 1, 8, 128>}]} {
    %c0 = arith.constant 0 : index
    %c0_0 = arith.constant 0 : index
    %0 = vector.load %arg1[%c0, %c0_0] : memref<16x32xf32, #tpu.memory_space<vmem>>, vector<16x32xf32>
    %c0_1 = arith.constant 0 : index
    %c0_2 = arith.constant 0 : index
    %1 = vector.load %arg2[%c0_1, %c0_2] : memref<16x1xi32, #tpu.memory_space<vmem>>, vector<16x1xi32>
    %c16_i32 = arith.constant 16 : i32
    %2 = arith.muli %arg0, %c16_i32 : i32
    %3 = tpu.iota {dimensions = array<i32: 0>} : vector<16x1xi32>
    %4 = vector.broadcast %2 : i32 to vector<16x1xi32>
    %5 = arith.addi %4, %3 : vector<16x1xi32>
    %c16_i32_3 = arith.constant 16 : i32
    %6 = vector.broadcast %c16_i32_3 : i32 to vector<16x1xi32>
    %7 = arith.cmpi slt, %5, %6 : vector<16x1xi32>
    %cst = arith.constant dense<0xFF800000> : vector<16xf32>
    %8 = vector.multi_reduction <maximumf>, %0, %cst [1] : vector<16x32xf32> to vector<16xf32>
    %9 = vector.shape_cast %8 : vector<16xf32> to vector<16x1xf32>
    %10 = vector.broadcast %9 : vector<16x1xf32> to vector<16x32xf32>
    %11 = arith.subf %0, %10 : vector<16x32xf32>
    %12 = math.exp %11 : vector<16x32xf32>
    %cst_4 = arith.constant dense<0.000000e+00> : vector<16xf32>
    %13 = vector.multi_reduction <add>, %12, %cst_4 [1] : vector<16x32xf32> to vector<16xf32>
    %14 = vector.shape_cast %13 : vector<16xf32> to vector<16x1xf32>
    %15 = math.log %14 : vector<16x1xf32>
    %16 = arith.addf %9, %15 : vector<16x1xf32>
    %17 = tpu.iota {dimensions = array<i32: 1>} : vector<16x32xi32>
    %18 = vector.broadcast %1 : vector<16x1xi32> to vector<16x32xi32>
    %19 = arith.cmpi eq, %17, %18 : vector<16x32xi32>
    %cst_5 = arith.constant 0.000000e+00 : f32
    %20 = vector.broadcast %cst_5 : f32 to vector<16x32xf32>
    %21 = arith.select %19, %0, %20 : vector<16x32xi1>, vector<16x32xf32>
    %cst_6 = arith.constant dense<0.000000e+00> : vector<16xf32>
    %22 = vector.multi_reduction <add>, %21, %cst_6 [1] : vector<16x32xf32> to vector<16xf32>
    %23 = vector.shape_cast %22 : vector<16xf32> to vector<16x1xf32>
    %c0_i32 = arith.constant 0 : i32
    %24 = vector.broadcast %c0_i32 : i32 to vector<16x1xi32>
    %25 = arith.cmpi ne, %1, %24 : vector<16x1xi32>
    %26 = arith.andi %7, %25 : vector<16x1xi1>
    %27 = arith.subf %16, %23 : vector<16x1xf32>
    %cst_7 = arith.constant 0.000000e+00 : f32
    %28 = vector.broadcast %cst_7 : f32 to vector<16x1xf32>
    %29 = arith.select %26, %27, %28 : vector<16x1xi1>, vector<16x1xf32>
    %30 = vector.shape_cast %29 : vector<16x1xf32> to vector<1x16x1xf32>
    %cst_8 = arith.constant dense<0.000000e+00> : vector<1xf32>
    %31 = vector.multi_reduction <add>, %30, %cst_8 [1, 2] : vector<1x16x1xf32> to vector<1xf32>
    %32 = vector.shape_cast %31 : vector<1xf32> to vector<1x1x1xf32>
    %33 = vector.extract %32[0, 0, 0] : f32 from vector<1x1x1xf32>
    %34 = vector.broadcast %33 : f32 to vector<1x1x1xf32>
    %35 = arith.extui %26 : vector<16x1xi1> to vector<16x1xi32>
    %36 = arith.sitofp %35 : vector<16x1xi32> to vector<16x1xf32>
    %37 = vector.shape_cast %36 : vector<16x1xf32> to vector<1x16x1xf32>
    %cst_9 = arith.constant dense<0.000000e+00> : vector<1xf32>
    %38 = vector.multi_reduction <add>, %37, %cst_9 [1, 2] : vector<1x16x1xf32> to vector<1xf32>
    %39 = vector.shape_cast %38 : vector<1xf32> to vector<1x1x1xf32>
    %40 = vector.extract %39[0, 0, 0] : f32 from vector<1x1x1xf32>
    %41 = vector.broadcast %40 : f32 to vector<1x1x1xf32>
    %42 = vector.shape_cast %34 : vector<1x1x1xf32> to vector<1x1x1xf32>
    %43 = vector.broadcast %42 : vector<1x1x1xf32> to vector<1x8x128xf32>
    %c0_10 = arith.constant 0 : index
    %c0_11 = arith.constant 0 : index
    %c0_12 = arith.constant 0 : index
    %44 = vector.load %arg3[%c0_10, %c0_11, %c0_12] : memref<1x8x128xf32, #tpu.memory_space<vmem>>, vector<1x8x128xf32>
    tpu.vector_store %arg3[%c0_10, %c0_11, %c0_12], %43 {strides = array<i32>} : memref<1x8x128xf32, #tpu.memory_space<vmem>>, vector<1x8x128xf32>,
    %45 = vector.shape_cast %41 : vector<1x1x1xf32> to vector<1x1x1xf32>
    %46 = vector.broadcast %45 : vector<1x1x1xf32> to vector<1x8x128xf32>
    %c0_13 = arith.constant 0 : index
    %c0_14 = arith.constant 0 : index
    %c0_15 = arith.constant 0 : index
    %47 = vector.load %arg4[%c0_13, %c0_14, %c0_15] : memref<1x8x128xf32, #tpu.memory_space<vmem>>, vector<1x8x128xf32>
    tpu.vector_store %arg4[%c0_13, %c0_14, %c0_15], %46 {strides = array<i32>} : memref<1x8x128xf32, #tpu.memory_space<vmem>>, vector<1x8x128xf32>,
    return
  }
  func.func @transform_0(%arg0: i32) -> (i32, i32) {
    %c0_i32 = arith.constant 0 : i32
    %c0_i32_0 = arith.constant 0 : i32
    return %arg0, %c0_i32 : i32, i32
  }
  func.func @transform_1(%arg0: i32) -> (i32, i32) {
    %c0_i32 = arith.constant 0 : i32
    %c0_i32_0 = arith.constant 0 : i32
    return %arg0, %c0_i32 : i32, i32
  }
  func.func @transform_2(%arg0: i32) -> (i32, i32, i32) {
    %c0_i32 = arith.constant 0 : i32
    %c0_i32_0 = arith.constant 0 : i32
    %c0_i32_1 = arith.constant 0 : i32
    return %arg0, %c0_i32, %c0_i32_0 : i32, i32, i32
  }
  func.func @transform_3(%arg0: i32) -> (i32, i32, i32) {
    %c0_i32 = arith.constant 0 : i32
    %c0_i32_0 = arith.constant 0 : i32
    %c0_i32_1 = arith.constant 0 : i32
    return %arg0, %c0_i32, %c0_i32_0 : i32, i32, i32
  }
}

</mosaic_0001>

<bundles_post_ra>
// kernel: custom_cross_entropy_loss.1
= control target key start
LH: loop header
LB: loop body
LE: loop exit
PB: predicated region body
PF: predicated region fallthrough
CT: control target
= control target key end

     0   :  { %vm26_vm0 = vcmask 261120   ;;  %v136_v2 = vmov 0   ;;  %v51_v11 = vlaneseq  ;;  %v137_v25 = vmov 0.0   ;;  %s190_s0 = inlined_call_operand.vmem [shape: f32[16,32], index: 0, kind: input, shape index: {}]   ;;  %s191_s1 = inlined_call_operand.vmem [shape: s32[16,1], index: 1, kind: input, shape index: {}]   ;;  %s192_s2 = inlined_call_operand.vmem [shape: f32[1,8,128], index: 2, kind: output, shape index: {0}]   ;;  %s193_s3 = inlined_call_operand.vmem [shape: f32[1,8,128], index: 3, kind: output, shape index: {1}]  }
   0x1   :  { %v13_v0 = vld [vmem:[%s190_s0] sm:$0xff]  ;;  %v14_v1 = vld [vmem:[%s190_s0 + $0x8] sm:$0xff]  ;;  %126 = vset.pattern.permute.xlu1 %v136_v2  ;;  %127 = vset.pattern.permute.xlu0 %v136_v2  ;;  %vm77_vm5 = vcmask 7168  }
   0x2   :  { %v15_v3 = vld [vmem:[%s191_s1] sm:$0xff]  ;;  %v27_v4 = vsel %vm26_vm0, %v13_v0, -inf  ;;  %v16_v5 = vld [vmem:[%s191_s1 + $0x8] sm:$0xff]  ;;  %v30_v6 = vsel %vm26_vm0, %v14_v1, -inf  ;;  %v52_v15 = vand.u32 127, %v51_v11 }
   0x3   :  { %54 = vperm.xlu1 %126, %v15_v3   ;;  %28 = vmax.xlane.f32.xlu0 %v27_v4  ;;  %vm69_vm3 = vcmp.ne.s32.totalorder %v15_v3, 0  ;;  %vm70_vm4 = vcmp.ne.s32.totalorder %v16_v5, 0 }
   0x4   :  { %v118_v26 = vsel %vm69_vm3, 1.0, %v137_v25  ;;  %v119_v27 = vsel %vm70_vm4, 1.0, %v137_v25 }
   0x5   :  { %v94_v28 = vsel %vm77_vm5, %v118_v26, 0.0  ;;  %v95_v29 = vsel %vm77_vm5, %v119_v27, 0.0 }
   0x6   :  { %v96_v30 = vadd.f32 %v95_v29, %v94_v28 }
   0x7   :  { %57 = vperm.xlu1 %126, %v16_v5   ;;  %31 = vmax.xlane.f32.xlu0 %v30_v6 }
  0x82   :  { %v55_v14 = vpop.permute.xlu1 %54 }
  0x83   :  { %vm59_vm1 = vcmp.eq.s32.totalorder %v52_v15, %v55_v14 }
  0x84   :  { %v61_v18 = vsel %vm59_vm1, %v13_v0, 0.0 }
  0x85   :  { %v63_v20 = vsel %vm26_vm0, %v61_v18, 0.0 }
  0x86   :  { %v58_v16 = vpop.permute.xlu1 %57 }
  0x87   :  { %vm60_vm2 = vcmp.eq.s32.totalorder %v52_v15, %v58_v16 }
  0x88   :  { %v62_v22 = vsel %vm60_vm2, %v14_v1, 0.0 }
  0x89   :  { %v66_v24 = vsel %vm26_vm0, %v62_v22, 0.0 }
  0x90   :  { %v29_v7 = vpop.xlane.xlu0 %28 }
  0x91   :  { %v33_v8 = vsub.f32 %v13_v0, %v29_v7 }
  0x93   :  { %v35_v9 = vmul.f32 1.442695, %v33_v8 }
  0x94   :  { %v32_v10 = vpop.xlane.xlu0 %31 }
  0x95   :  { %128 = vpow2.f32 %v35_v9  ;;  %v34_v12 = vsub.f32 %v14_v1, %v32_v10 }
  0x97   :  { %v37_v13 = vmul.f32 1.442695, %v34_v12 }
  0x99   :  { %130 = vpow2.f32 %v37_v13 }
  0x9f   :  { %v129_v17 = vpop.eup %128 }
  0xa0   :  { %v39_v19 = vsel %vm26_vm0, %v129_v17, 0.0 }
  0xa1   :  { %40 = vadd.xlane.f32.xlu0 %v39_v19 }
  0xa3   :  { %v131_v21 = vpop.eup %130 }
  0xa4   :  { %v42_v23 = vsel %vm26_vm0, %v131_v21, 0.0 }
  0xa5   :  { %43 = vadd.xlane.f32.xlu1 %v42_v23  ;;  %64 = vadd.xlane.f32.xlu0 %v63_v20 }
  0xa9   :  { %67 = vadd.xlane.f32.xlu0 %v66_v24 }
 0x12e   :  { %v41_v31 = vpop.xlane.xlu0 %40 }
 0x12f   :  { %132 = vlog2.f32 %v41_v31 }
 0x132   :  { %v44_v32 = vpop.xlane.xlu1 %43  ;;  %v65_v35 = vpop.xlane.xlu0 %64 }
 0x133   :  { %134 = vlog2.f32 %v44_v32 }
 0x136   :  { %v68_v41 = vpop.xlane.xlu0 %67 }
 0x139   :  { %v133_v33 = vpop.eup %132 }
 0x13a   :  { %v46_v34 = vmul.f32 0.6931472, %v133_v33 }
 0x13c   :  { %v49_v36 = vadd.f32 %v46_v34, %v29_v7 }
 0x13d   :  { %v135_v37 = vpop.eup %134 }
 0x13e   :  { %v48_v38 = vmul.f32 0.6931472, %v135_v37  ;;  %v73_v39 = vsub.f32 %v49_v36, %v65_v35 }
 0x140   :  { %v50_v40 = vadd.f32 %v48_v38, %v32_v10  ;;  %v75_v42 = vsel %vm69_vm3, %v73_v39, 0.0 }
 0x141   :  { %v78_v45 = vsel %vm77_vm5, %v75_v42, 0.0 }
 0x142   :  { %v74_v43 = vsub.f32 %v50_v40, %v68_v41 }
 0x144   :  { %v76_v44 = vsel %vm70_vm4, %v74_v43, 0.0 }
 0x145   :  { %v79_v46 = vsel %vm77_vm5, %v76_v44, 0.0 }
 0x146   :  { %v80_v47 = vadd.f32 %v79_v46, %v78_v45 }
 0x148   :  { %81 = vadd.xlane.f32.xlu0 %v80_v47 }
 0x14c   :  { %97 = vadd.xlane.f32.xlu0 %v96_v30 }
 0x1d5   :  { %v82_v48 = vpop.xlane.xlu0 %81 }
 0x1d6   :  { %v83_v49 = vrot.slane %v82_v48, 4 }
 0x1d8   :  { %v84_v50 = vadd.f32 %v83_v49, %v82_v48 }
 0x1d9   :  { %v98_v51 = vpop.xlane.xlu0 %97 }
 0x1da   :  { %v85_v52 = vrot.slane %v84_v50, 2  ;;  %v99_v53 = vrot.slane %v98_v51, 4 }
 0x1dc   :  { %v100_v54 = vadd.f32 %v99_v53, %v98_v51  ;;  %v86_v55 = vadd.f32 %v85_v52, %v84_v50 }
 0x1de   :  { %v101_v56 = vrot.slane %v100_v54, 2  ;;  %v87_v57 = vrot.slane %v86_v55, 1 }
 0x1e0   :  { %v102_v58 = vadd.f32 %v101_v56, %v100_v54  ;;  %v88_v59 = vadd.f32 %v87_v57, %v86_v55 }
 0x1e2   :  { %120 = vpush %v88_v59  ;;  %v103_v60 = vrot.slane %v102_v58, 1 }
 0x1e4   :  { %v104_v61 = vadd.f32 %v103_v60, %v102_v58 }
 0x1e6   :  { %122 = vpush %v104_v61 }
 0x213   :  { %s121_s0 = spop %120 }
 0x214   :  { %v106_v62 = vstv %s121_s0 }
 0x215   :  { %107 = vst [vmem:[%s192_s2] sm:$0xff] %v106_v62 }
 0x217   :  { %s123_s21 = spop %122 }
 0x218   :  { %v108_v63 = vstv %s123_s21 }
 0x219   :  { %109 = vst [vmem:[%s193_s3] sm:$0xff] %v108_v63 }

</bundles_post_ra>
